<compile_context>
chip_gen: v6e
topology: v6e:2x2x1
jax: 0.10.0
libtpu: 0.0.40
codegen_flags: <defaults>
</compile_context>

<pallas_src>
from functools import partial

import jax
import jax.numpy as jnp
from jax.experimental import pallas as pl
from jax.experimental.pallas import tpu as pltpu

LANES = 128  # TPU lane width; all slabs are (rows, 128) f32


def _round8(x):
    return -(-x // 8) * 8


def _param_offsets(C, H):
    """8-aligned row offsets of each parameter block inside the packed slab."""
    r_wih = 0
    r_whh = r_wih + _round8(C)
    r_w1 = r_whh + _round8(H)
    r_wfc = r_w1 + _round8(H)
    r_b = r_wfc + _round8(H)
    rows = _round8(r_b + 3)
    return r_wih, r_whh, r_w1, r_wfc, r_b, rows


def _make_kernel(B, T, C, H, I):
    f32 = jnp.float32
    r_wih, r_whh, r_w1, r_wfc, r_b, _ = _param_offsets(C, H)
    theta_base = B  # output slab: hidden rows [0,B), theta rows [B, B+B*T)

    def kernel(ctx_ref, obs_ref, p_ref, out_ref):
        # ---- parameter views (static slices of the one packed slab) ---------
        # Full 128-lane rows: lanes >= H (or >= I) hold zeros, so every matmul
        # result below is already lane-dense and every store is unmasked.
        wih = p_ref[r_wih:r_wih + C, :]            # (C, 128)
        w1 = p_ref[r_w1:r_w1 + H, :]               # (H, 128)
        wfc = p_ref[r_wfc:r_wfc + H, :]            # (H, 128)
        b_rnn = p_ref[r_b:r_b + 1, :]              # (1, 128)  == b_ih + b_hh
        b1 = p_ref[r_b + 1:r_b + 2, :]
        bfc = p_ref[r_b + 2:r_b + 3, :]
        whh = p_ref[r_whh:r_whh + H, :] if T > 1 else None  # unused for T == 1

        # bias broadcasts hoisted once (JAX doesn't CSE broadcast_in_dim)
        b_rnn_b = jnp.broadcast_to(b_rnn, (B, LANES))
        b1_b = jnp.broadcast_to(b1, (B, LANES))
        bfc_b = jnp.broadcast_to(bfc, (B, LANES))

        obs = obs_ref[...]                         # (B, 128), zero beyond I

        # ---- RNN recurrence (tanh, h0 = 0) with fused theta head per step ---
        # Statically unrolled: T is a trace-time constant and small.
        h = None
        theta_t1 = None
        for t in range(T):
            x_t = ctx_ref[...] if T == 1 else ctx_ref[:, t, :]   # (B, C)
            pre = jnp.dot(x_t, wih, preferred_element_type=f32) + b_rnn_b
            if t > 0:                              # h0 == 0 -> skip at t == 0
                pre = pre + jnp.dot(h[:, :H], whh, preferred_element_type=f32)
            h = jnp.tanh(pre)                      # (B, 128), lanes >= H are 0

            # theta head: relu -> fc1 -> relu -> fc (row-wise)
            z = jnp.maximum(h, 0.0)
            z = jnp.maximum(
                jnp.dot(z[:, :H], w1, preferred_element_type=f32) + b1_b, 0.0)
            theta_t = (jnp.dot(z[:, :H], wfc, preferred_element_type=f32)
                       + bfc_b)                    # (B, 128), lanes >= I are 0

            if T == 1:
                out_ref[theta_base:theta_base + B, :] = theta_t
                theta_t1 = theta_t
            else:
                # PyTorch flat row order of .view(-1, H): row = b*T + t.
                for b in range(B):
                    r = theta_base + b * T + t
                    out_ref[r:r + 1, :] = theta_t[b:b + 1, :]

        # ---- logits[i] = obs[i] . theta_flat[i]  (diag of obs @ theta.T) ----
        if T == 1:
            sel = theta_t1
        else:
            sel = out_ref[theta_base:theta_base + B, :]   # flat rows 0..B-1 (view)
        logits = jnp.sum(obs * sel, axis=-1, keepdims=True)   # (B, 1)
        prob = jax.nn.sigmoid(logits)

        # ---- hidden rows with prob tucked into lane H (which is zero in h) --
        lane = jax.lax.broadcasted_iota(jnp.int32, (B, LANES), 1)
        out_ref[0:B, :] = jnp.where(lane == H, prob, h)

    return kernel


def prepare_params(p):
    """One-time prep: pack all weights/biases into a single (rows, 128) slab.

    Weights are transposed to (in, out); b_ih + b_hh pre-summed.  Lanes beyond
    H / I stay zero so in-kernel matmul outputs are lane-dense by construction.
    """
    H = p["w_hh"].shape[0]
    C = p["w_ih"].shape[1]
    I = p["w_fc"].shape[0]
    r_wih, r_whh, r_w1, r_wfc, r_b, rows = _param_offsets(C, H)
    slab = jnp.zeros((rows, LANES), jnp.float32)
    slab = slab.at[r_wih:r_wih + C, :H].set(jnp.asarray(p["w_ih"].T, jnp.float32))
    slab = slab.at[r_whh:r_whh + H, :H].set(jnp.asarray(p["w_hh"].T, jnp.float32))
    slab = slab.at[r_w1:r_w1 + H, :H].set(jnp.asarray(p["w_fc1"].T, jnp.float32))
    slab = slab.at[r_wfc:r_wfc + H, :I].set(jnp.asarray(p["w_fc"].T, jnp.float32))
    slab = slab.at[r_b, :H].set(jnp.asarray(p["b_ih"] + p["b_hh"], jnp.float32))
    slab = slab.at[r_b + 1, :H].set(jnp.asarray(p["b_fc1"], jnp.float32))
    slab = slab.at[r_b + 2, :I].set(jnp.asarray(p["b_fc"], jnp.float32))
    return slab


@partial(jax.jit, static_argnames=("hidden_dim",))
def contextualized_sigmoid_forward(context, observation, params_slab, *, hidden_dim=16):
    """context: (B, T, context_size); observation: (B, 1, input_size) (input_size > 1);
    params_slab: output of prepare_params().
    Returns (prob (B,), hidden (1, B, H), theta (B*T, input_size))."""
    B, T, C = context.shape
    H = hidden_dim
    assert H < LANES, "prob is stored at lane H of the hidden rows"

    obs = jnp.asarray(observation, jnp.float32).reshape(B, -1)   # .squeeze() (I != 1)
    I = obs.shape[-1]
    obs_pad = jnp.pad(obs, ((0, 0), (0, LANES - I)))             # lane-dense input

    ctx = jnp.asarray(context, jnp.float32)
    ctx_in = ctx.reshape(B, C) if T == 1 else ctx                # free reshape under jit

    rows_out = B + B * T                                         # hidden rows + theta rows
    flops = 2 * B * T * (C * H + H * H + H * I) + 2 * B * max(T - 1, 0) * H * H
    bytes_accessed = 4 * (ctx_in.size + obs_pad.size + params_slab.size
                          + rows_out * LANES)
    cost = pl.CostEstimate(flops=flops, transcendentals=B * T + B,
                           bytes_accessed=bytes_accessed)

    vmem = pltpu.MemorySpace.VMEM
    # Whole problem fits in VMEM -> grid-less single invocation (1 TC); see
    # TODO(synk) at the top for the v7x large-B batch-block 'parallel' grid.
    slab_out = pl.pallas_call(
        _make_kernel(B, T, C, H, I),
        out_shape=jax.ShapeDtypeStruct((rows_out, LANES), jnp.float32),
        in_specs=[pl.BlockSpec(memory_space=vmem)] * 3,
        out_specs=pl.BlockSpec(memory_space=vmem),
        cost_estimate=cost,
    )(ctx_in, obs_pad, params_slab)

    hidden = slab_out[0:B, :H].reshape(1, B, H)      # n_layers = 1
    prob = slab_out[0:B, H]                          # (B,)
    theta = slab_out[B:B + B * T, :I]                # already flat (b*T + t) order
    return prob, hidden, theta


def init_params(key, hidden_dim=16, context_size=6, input_size=6):
    """Deterministic PyTorch-style uniform(-1/sqrt(H), 1/sqrt(H)) init."""
    H, C, I = hidden_dim, context_size, input_size
    ks = jax.random.split(key, 8)

    def u(k, shape):
        bound = 1.0 / jnp.sqrt(jnp.float32(H))
        return jax.random.uniform(k, shape, jnp.float32, -bound, bound)

    return dict(
        w_ih=u(ks[0], (H, C)), w_hh=u(ks[1], (H, H)),
        b_ih=u(ks[2], (H,)), b_hh=u(ks[3], (H,)),
        w_fc1=u(ks[4], (H, H)), b_fc1=u(ks[5], (H,)),
        w_fc=u(ks[6], (I, H)), b_fc=u(ks[7], (I,)),
    )


def reference_forward(context, observation, p):
    """Pure-JAX reference matching the PyTorch forward."""
    B, T, _ = context.shape
    H = p["w_hh"].shape[0]
    obs = observation.reshape(B, -1)
    h = jnp.zeros((B, H), jnp.float32)
    outs = []
    for t in range(T):
        h = jnp.tanh(context[:, t, :] @ p["w_ih"].T + p["b_ih"]
                     + h @ p["w_hh"].T + p["b_hh"])
        outs.append(h)
    rnn_out = jnp.stack(outs, axis=1).reshape(B * T, H)
    x = jax.nn.relu(rnn_out)
    x = jax.nn.relu(x @ p["w_fc1"].T + p["b_fc1"])
    theta = x @ p["w_fc"].T + p["b_fc"]
    logits = jnp.diagonal(obs @ theta.T)
    return jax.nn.sigmoid(logits), h[None], theta


if __name__ == "__main__":
    key = jax.random.PRNGKey(0)
    k_p, k_c, k_o = jax.random.split(key, 3)

    B, T, C, I, H = 8, 1, 6, 6, 16     # batch=8, seq=1 (typical usage of the module)
    raw_params = init_params(k_p, hidden_dim=H, context_size=C, input_size=I)
    params_slab = prepare_params(raw_params)   # one-time weight packing (not per call)

    context = jax.random.normal(k_c, (B, T, C), jnp.float32)
    observation = jax.random.normal(k_o, (B, 1, I), jnp.float32)

    prob, hidden, theta = contextualized_sigmoid_forward(
        context, observation, params_slab, hidden_dim=H)
    jax.block_until_ready((prob, hidden, theta))

    prob_r, hidden_r, theta_r = reference_forward(context, observation, raw_params)
    assert prob.shape == (B,) and hidden.shape == (1, B, H) and theta.shape == (B * T, I)
    assert jnp.allclose(prob, prob_r, atol=1e-5)
    assert jnp.allclose(hidden, hidden_r, atol=1e-5)
    assert jnp.allclose(theta, theta_r, atol=1e-5)

    print("KERNEL_OK")
</pallas_src>

<mosaic_0001>
module attributes {stable_mosaic.version = 11 : i64} {
  func.func @kernel(%arg0: memref<8x6xf32, #tpu.memory_space<vmem>>, %arg1: memref<8x128xf32, #tpu.memory_space<vmem>>, %arg2: memref<64x128xf32, #tpu.memory_space<vmem>>, %arg3: memref<16x128xf32, #tpu.memory_space<vmem>>) attributes {dimension_semantics = [], scalar_prefetch = 0 : i64, scratch_operands = 0 : i64, tpu.core_type = #tpu.core_type<tc>} {
    %c0 = arith.constant 0 : index
    %c0_0 = arith.constant 0 : index
    %0 = vector.load %arg2[%c0, %c0_0] : memref<64x128xf32, #tpu.memory_space<vmem>>, vector<6x128xf32>
    %c24 = arith.constant 24 : index
    %c0_1 = arith.constant 0 : index
    %1 = vector.load %arg2[%c24, %c0_1] : memref<64x128xf32, #tpu.memory_space<vmem>>, vector<16x128xf32>
    %c40 = arith.constant 40 : index
    %c0_2 = arith.constant 0 : index
    %2 = vector.load %arg2[%c40, %c0_2] : memref<64x128xf32, #tpu.memory_space<vmem>>, vector<16x128xf32>
    %c56 = arith.constant 56 : index
    %c0_3 = arith.constant 0 : index
    %3 = vector.load %arg2[%c56, %c0_3] : memref<64x128xf32, #tpu.memory_space<vmem>>, vector<1x128xf32>
    %c57 = arith.constant 57 : index
    %c0_4 = arith.constant 0 : index
    %4 = vector.load %arg2[%c57, %c0_4] : memref<64x128xf32, #tpu.memory_space<vmem>>, vector<1x128xf32>
    %c58 = arith.constant 58 : index
    %c0_5 = arith.constant 0 : index
    %5 = vector.load %arg2[%c58, %c0_5] : memref<64x128xf32, #tpu.memory_space<vmem>>, vector<1x128xf32>
    %6 = vector.shape_cast %3 : vector<1x128xf32> to vector<1x128xf32>
    %7 = vector.broadcast %6 : vector<1x128xf32> to vector<8x128xf32>
    %8 = vector.shape_cast %4 : vector<1x128xf32> to vector<1x128xf32>
    %9 = vector.broadcast %8 : vector<1x128xf32> to vector<8x128xf32>
    %10 = vector.shape_cast %5 : vector<1x128xf32> to vector<1x128xf32>
    %11 = vector.broadcast %10 : vector<1x128xf32> to vector<8x128xf32>
    %c0_6 = arith.constant 0 : index
    %c0_7 = arith.constant 0 : index
    %12 = vector.load %arg1[%c0_6, %c0_7] : memref<8x128xf32, #tpu.memory_space<vmem>>, vector<8x128xf32>
    %c0_8 = arith.constant 0 : index
    %c0_9 = arith.constant 0 : index
    %13 = vector.load %arg0[%c0_8, %c0_9] : memref<8x6xf32, #tpu.memory_space<vmem>>, vector<8x6xf32>
    %cst = arith.constant dense<0.000000e+00> : vector<8x128xf32>
    %14 = tpu.matmul %13, %0, %cst {dimension_numbers = #tpu.dot_dimension_numbers<[1], [0], [0], [1], [0, 0, 1, 1], [], []>} : vector<8x6xf32>, vector<6x128xf32>, vector<8x128xf32> -> vector<8x128xf32>
    %15 = arith.addf %14, %7 : vector<8x128xf32>
    %16 = math.tanh %15 : vector<8x128xf32>
    %cst_10 = arith.constant 0.000000e+00 : f32
    %17 = vector.broadcast %cst_10 : f32 to vector<8x128xf32>
    %18 = arith.maximumf %16, %17 : vector<8x128xf32>
    %19 = vector.extract_strided_slice %18 {offsets = [0, 0], sizes = [8, 16], strides = [1, 1]} : vector<8x128xf32> to vector<8x16xf32>
    %cst_11 = arith.constant dense<0.000000e+00> : vector<8x128xf32>
    %20 = tpu.matmul %19, %1, %cst_11 {dimension_numbers = #tpu.dot_dimension_numbers<[1], [0], [0], [1], [0, 0, 1, 1], [], []>} : vector<8x16xf32>, vector<16x128xf32>, vector<8x128xf32> -> vector<8x128xf32>
    %21 = arith.addf %20, %9 : vector<8x128xf32>
    %cst_12 = arith.constant 0.000000e+00 : f32
    %22 = vector.broadcast %cst_12 : f32 to vector<8x128xf32>
    %23 = arith.maximumf %21, %22 : vector<8x128xf32>
    %24 = vector.extract_strided_slice %23 {offsets = [0, 0], sizes = [8, 16], strides = [1, 1]} : vector<8x128xf32> to vector<8x16xf32>
    %cst_13 = arith.constant dense<0.000000e+00> : vector<8x128xf32>
    %25 = tpu.matmul %24, %2, %cst_13 {dimension_numbers = #tpu.dot_dimension_numbers<[1], [0], [0], [1], [0, 0, 1, 1], [], []>} : vector<8x16xf32>, vector<16x128xf32>, vector<8x128xf32> -> vector<8x128xf32>
    %26 = arith.addf %25, %11 : vector<8x128xf32>
    %c8 = arith.constant 8 : index
    %c0_14 = arith.constant 0 : index
    %27 = vector.load %arg3[%c8, %c0_14] : memref<16x128xf32, #tpu.memory_space<vmem>>, vector<8x128xf32>
    tpu.vector_store %arg3[%c8, %c0_14], %26 {strides = array<i32>} : memref<16x128xf32, #tpu.memory_space<vmem>>, vector<8x128xf32>,
    %28 = arith.mulf %12, %26 : vector<8x128xf32>
    %cst_15 = arith.constant dense<0.000000e+00> : vector<8xf32>
    %29 = vector.multi_reduction <add>, %28, %cst_15 [1] : vector<8x128xf32> to vector<8xf32>
    %30 = vector.shape_cast %29 : vector<8xf32> to vector<8x1xf32>
    %31 = arith.negf %30 : vector<8x1xf32>
    %32 = math.exp %31 : vector<8x1xf32>
    %cst_16 = arith.constant 1.000000e+00 : f32
    %33 = vector.broadcast %cst_16 : f32 to vector<8x1xf32>
    %34 = arith.addf %33, %32 : vector<8x1xf32>
    %35 = arith.divf %33, %34 : vector<8x1xf32>
    %36 = tpu.iota {dimensions = array<i32: 1>} : vector<8x128xi32>
    %c16_i32 = arith.constant 16 : i32
    %37 = vector.broadcast %c16_i32 : i32 to vector<8x128xi32>
    %38 = arith.cmpi eq, %36, %37 : vector<8x128xi32>
    %39 = vector.shape_cast %35 : vector<8x1xf32> to vector<8x1xf32>
    %40 = vector.broadcast %39 : vector<8x1xf32> to vector<8x128xf32>
    %41 = arith.select %38, %40, %16 : vector<8x128xi1>, vector<8x128xf32>
    %c0_17 = arith.constant 0 : index
    %c0_18 = arith.constant 0 : index
    %42 = vector.load %arg3[%c0_17, %c0_18] : memref<16x128xf32, #tpu.memory_space<vmem>>, vector<8x128xf32>
    tpu.vector_store %arg3[%c0_17, %c0_18], %41 {strides = array<i32>} : memref<16x128xf32, #tpu.memory_space<vmem>>, vector<8x128xf32>,
    return
  }
}

</mosaic_0001>

<bundles_post_ra>
// kernel: contextualized_sigmoid_forward.1
= control target key start
LH: loop header
LB: loop body
LE: loop exit
PB: predicated region body
PF: predicated region fallthrough
CT: control target
= control target key end

     0   :  { %8 = vsyncpa [#allocation3], 0  ;;  %s366_s12 = smov [#allocation2]   ;;  %s406_s0 = inlined_call_operand.vmem [shape: f32[8,6], index: 0, kind: input, shape index: {}]   ;;  %s407_s1 = inlined_call_operand.vmem [shape: f32[8,128], index: 1, kind: input, shape index: {}]   ;;  %s408_s2 = inlined_call_operand.hbm [shape: f32[64,128], index: 2, kind: input, shape index: {}]   ;;  %s409_s3 = inlined_call_operand.vmem [shape: f32[16,128], index: 3, kind: output, shape index: {}]  }
   0x1   :  { %s18_s13 = sshll.u32 %s366_s12, 4  ;;  %s19_s13 = int_to_ptr.vmem [resolvable:$true] %s18_s13 }
   0x2   :  { %s352_s14 = scalar_lea.vmem %s19_s13, 1024  ;;  %p357_p1 = scmp.lt.s32.totalorder %s19_s13, %s19_s13 }
   0x3   :  { %p353_p0 = scmp.ne.s32.totalorder %s19_s13, %s352_s14  ;;  %p358_p2 = scmp.lt.s32.totalorder %s352_s14, %s352_s14 }
   0x5   :  { %p359_p3 = por %p358_p2, %p357_p1 }
   0x7   :  { %p360_p4 = pnand %p359_p3, %p353_p0 }
   0x9   :  { %363 = shalt.err (!%p360_p4)
}
   0xa   :  { %s367_s15 = smov 128   ;;  %s368_s16 = smov 8  }
   0xb   :  { %24 = dma.hbm_to_vmem [thread:$0]  %s408_s2, 1024, %s19_s13, [#allocation3], %s367_s15, %s367_s15, %s368_s16  }
   0xc   :  { %364 = dma.done.wait [#allocation3], 1024  }
   0xd   :  { %365 = vsyncadd [#allocation3], 4294966272  ;;  %v369_v0 = vmov 0.0   ;;  %vm370_vm0 = vmmov 0   ;;  %vm54_vm1 = vcmask 1045504   ;;  %vm50_vm2 = vcmask 48128  }
   0xe   :  { %314 = vmatprep.subr.mxu0 %v369_v0  ;;  %316 = vmatprep.mubr.msk.f32.mxu0 %vm370_vm0, %v369_v0  ;;  %v28_v1 = vld [vmem:[#allocation2] sm:$0x3f]  ;;  %v29_v4 = vld [vmem:[#allocation2 + $0x18] sm:$0xff]  ;;  %vm130_vm3 = vcmask 130048   ;;  %v32_v11 = vld [vmem:[#allocation2 + $0x30] sm:$0xff]  ;;  %v288_v28 = vlaneseq }
   0xf   :  { %319 = vmatprep.subr.mxu1 %v369_v0  ;;  %323 = vmatprep.mubr.msk.f32.mxu1 %vm370_vm0, %v369_v0  ;;  %v49_v2 = vld [vmem:[%s406_s0] sm:$0xff]  ;;  %v298_v5 = vld [vmem:[#allocation2 + $0x38] ss:$0 sm:$0xff]  ;;  %v31_v12 = vld [vmem:[#allocation2 + $0x28] sm:$0xff] }
  0x10   :  { %315 = vmatpush3.msk.msra.mxu0 %vm54_vm1, %v28_v1  ;;  %v30_v3 = vld [vmem:[#allocation2 + $0x20] sm:$0xff]  ;;  %v299_v13 = vld [vmem:[#allocation2 + $0x39] ss:$0 sm:$0xff]  ;;  %v300_v18 = vld [vmem:[#allocation2 + $0x3a] ss:$0 sm:$0xff]  ;;  %v289_v29 = vand.u32 127, %v288_v28 }
  0x11   :  { %317 = vmatmul.mubr.msk.f32.vlgmr.msra.gmra.mxu0 %vm50_vm2, %v49_v2  ;;  %326 = vmatprep.subr.mxu0 %v369_v0  ;;  %v48_v20 = vld [vmem:[%s407_s1] sm:$0xff] }
  0x12   :  { %330 = vmatprep.mubr.msk.f32.mxu0 %vm370_vm0, %v369_v0  ;;  %320 = vmatpush3.msra.mxu1 %v30_v3  ;;  %vm290_vm4 = vcmp.eq.s32.totalorder %v289_v29, 16 }
  0x13   :  { %321 = vmatprep.subr.mxu1 %v369_v0  ;;  %327 = vmatpush3.msra.mxu0 %v32_v11 }
  0x14   :  { %322 = vmatpush3.msra.mxu1 %v29_v4  ;;  %328 = vmatprep.subr.mxu0 %v369_v0 }
  0x15   :  { %329 = vmatpush3.msra.mxu0 %v31_v12 }
  0xd1   :  { %v124_v6 = vpop.f32.mrf.mxu0 }
  0xd2   :  { %v125_v7 = vadd.f32 %v298_v5, %v124_v6 }
  0xd3   :  { %v318_v8 = vpop.f32.mrf.mxu0 }
  0xd4   :  { %338 = vtanh.f32 %v125_v7 }
  0xe1   :  { %v339_v9 = vpop.eup %338 }
  0xe2   :  { %v129_v10 = vmax.f32 %v339_v9, 0.0 }
  0xe4   :  { %324 = vmatmul.mubr.msk.f32.vlgmr.msra.gmra.mxu1 %vm130_vm3, %v129_v10 }
 0x1a4   :  { %v200_v14 = vpop.f32.mrf.mxu1 }
 0x1a5   :  { %v201_v15 = vadd.f32 %v299_v13, %v200_v14 }
 0x1a6   :  { %v325_v16 = vpop.f32.mrf.mxu1 }
 0x1a7   :  { %v204_v17 = vmax.f32 %v201_v15, 0.0 }
 0x1a9   :  { %331 = vmatmul.mubr.msk.f32.vlgmr.msra.gmra.mxu0 %vm130_vm3, %v204_v17 }
 0x269   :  { %v274_v19 = vpop.f32.mrf.mxu0 }
 0x26a   :  { %v275_v21 = vadd.f32 %v300_v18, %v274_v19 }
 0x26b   :  { %v332_v22 = vpop.f32.mrf.mxu0 }
 0x26c   :  { %278 = vst [vmem:[%s409_s3 + $0x8] sm:$0xff] %v275_v21  ;;  %v279_v23 = vmul.f32 %v275_v21, %v48_v20 }
 0x26e   :  { %280 = vadd.xlane.f32.xlu0 %v279_v23 }
 0x2f7   :  { %v281_v24 = vpop.xlane.xlu0 %280 }
 0x2f8   :  { %v305_v25 = vmul.f32 -1.442695, %v281_v24 }
 0x2fa   :  { %340 = vpow2.f32 %v305_v25 }
 0x307   :  { %v341_v26 = vpop.eup %340 }
 0x308   :  { %v285_v27 = vadd.f32 1.0, %v341_v26 }
 0x30a   :  { %342 = vrcp.f32 %v285_v27 }
 0x317   :  { %v343_v30 = vpop.eup %342 }
 0x318   :  { %v291_v31 = vsel %vm290_vm4, %v343_v30, %v339_v9 }
 0x319   :  { %292 = vst [vmem:[%s409_s3] sm:$0xff] %v291_v31 }
 0x31a   :  { %297 = vsyncpa [#allocation3], 1 }

</bundles_post_ra>
